<compile_context>
chip_gen: v7x
topology: tpu7x:2x2x1
jax: 0.10.0
libtpu: 0.0.40
codegen_flags: <defaults>
</compile_context>

<pallas_src>
import jax
import jax.numpy as jnp
from jax.experimental import pallas as pl
from jax.experimental.pallas import tpu as pltpu


def _round_up(n, m):
    return ((n + m - 1) // m) * m


def _cdiv(a, b):
    return -(-a // b)


def hecnn_kernel(x_ref, w1_ref, b1_ref, w2_ref, b2_ref, o_ref):
    # fc1 on the MXU: (TB, 784) @ (784, 32), f32 accumulation.
    h = jnp.dot(x_ref[...], w1_ref[...], preferred_element_type=jnp.float32)
    h = h + b1_ref[...]
    # Square activation (VPU, f32).
    h = h * h
    # fc2 on the (otherwise idle) MXU: (TB, 32) @ (32, 1) + b2 -> (TB, 1).
    out = jnp.dot(h, w2_ref[...], preferred_element_type=jnp.float32) + b2_ref[...]
    o_ref[...] = out.astype(o_ref.dtype)


def _choose_tile(B, tb_max, align):
    """Batch-tile rows: multiple of `align`; >= 2 even tiles once B > 128."""
    Bpa = _round_up(max(B, align), align)
    if Bpa <= 128:
        return Bpa                         # tiny batch: one small tile, no 128-pad
    n = max(2, _cdiv(Bpa, tb_max))         # at least 2 tiles (v7x megacore)
    if n % 2:
        n += 1                             # even tile count -> both TCs busy
    return _round_up(_cdiv(Bpa, n), align)


def _x_block_spec(TB, K, buffers):
    idx = lambda i: (i, 0)
    if buffers > 2:
        try:
            return pl.BlockSpec((TB, K), idx, pipeline_mode=pl.Buffered(buffers))
        except Exception:  # older jax without pipeline_mode: fall back to double-buffer
            pass
    return pl.BlockSpec((TB, K), idx)


def hecnn_forward(x, w1, b1, w2, b2, *, tb=None, stream_dtype=jnp.bfloat16):
    """x: (B, 784); w1: (784, 32); b1: (1, 32); w2: (32, 1); b2: (1, 1).

    Returns (B, 1), matching PyTorch HECNN.forward with weights stored as
    (in_features, out_features) (transpose of nn.Linear's weight). x and w1 are
    streamed in `stream_dtype` (bf16 by default); accumulation, bias, square
    and fc2 stay in float32.
    """
    B, K = x.shape
    out_dtype = x.dtype
    itemsize = jnp.dtype(stream_dtype).itemsize
    align = max(8, 32 // itemsize)         # 8 rows for f32, 16 for bf16 (sublane packing)

    # Generation-aware VMEM budget (v7x: 64 MiB/TC; v5e/v6e: 128 MiB).
    try:
        vmem_cap = int(pltpu.get_tpu_info().vmem_capacity_bytes)
    except Exception:
        vmem_cap = 64 * 1024 * 1024        # conservative (v7x) if query unavailable
    lanes = _round_up(K, 128)              # 784 -> 896 lane padding of the x block
    # Per-row VMEM cost assuming 3 x-buffers + 2 lane-padded f32 out-buffers.
    per_row = lanes * itemsize * 3 + 128 * 4 * 2
    tb_cap = max(128, (vmem_cap * 3 // 4 - (6 << 20)) // per_row)
    tb_cap = tb_cap // align * align

    if tb is None:
        tb = 4096 if itemsize <= 2 else 2048
    tb_max = min(_round_up(tb, align), tb_cap)

    TB = _choose_tile(B, tb_max, align)
    Bp = _round_up(B, TB)
    num_tiles = Bp // TB
    n_buf = 3 if num_tiles >= 3 else 2

    # Cast the streamed operands; pad the batch to a whole number of tiles.
    xs = x.astype(stream_dtype)
    w1s = w1.astype(stream_dtype)
    if Bp != B:
        xs = jnp.pad(xs, ((0, Bp - B), (0, 0)))

    # Real VMEM footprint: x buffers + lane-padded out buffers + headroom.
    x_bytes = TB * lanes * itemsize * n_buf
    out_bytes = TB * 128 * 4 * 2
    vmem_limit = int(max(32 << 20,
                         min(x_bytes + out_bytes + (8 << 20),
                             vmem_cap - (8 << 20))))

    weight_bytes = (K * 32 + 32) * itemsize + (32 + 1) * 4
    cost = pl.CostEstimate(
        flops=2 * Bp * K * 32 + 2 * Bp * 32,
        transcendentals=0,
        bytes_accessed=Bp * K * itemsize + Bp * 4 + weight_bytes,
    )

    out = pl.pallas_call(
        hecnn_kernel,
        out_shape=jax.ShapeDtypeStruct((Bp, 1), out_dtype),
        grid=(num_tiles,),
        in_specs=[
            _x_block_spec(TB, K, n_buf),                  # x: streamed per tile
            pl.BlockSpec(w1s.shape, lambda i: (0, 0)),    # weights: VMEM-resident
            pl.BlockSpec(b1.shape, lambda i: (0, 0)),
            pl.BlockSpec(w2.shape, lambda i: (0, 0)),
            pl.BlockSpec(b2.shape, lambda i: (0, 0)),
        ],
        out_specs=pl.BlockSpec((TB, 1), lambda i: (i, 0)),
        compiler_params=pltpu.CompilerParams(
            dimension_semantics=("parallel",),
            vmem_limit_bytes=vmem_limit,
        ),
        cost_estimate=cost,
    )(xs, w1s, b1, w2, b2)

    return out[:B]


def init_params(key, dtype=jnp.float32):
    """Deterministic init matching nn.Linear shapes (784->32, 32->1)."""
    k1, k2, k3, k4 = jax.random.split(key, 4)
    bound1 = 1.0 / (784.0 ** 0.5)
    bound2 = 1.0 / (32.0 ** 0.5)
    # Stored as (in, out): transpose of PyTorch's (out, in) weight.
    w1 = jax.random.uniform(k1, (784, 32), dtype, minval=-bound1, maxval=bound1)
    b1 = jax.random.uniform(k2, (1, 32), dtype, minval=-bound1, maxval=bound1)
    w2 = jax.random.uniform(k3, (32, 1), dtype, minval=-bound2, maxval=bound2)
    b2 = jax.random.uniform(k4, (1, 1), dtype, minval=-bound2, maxval=bound2)
    return w1, b1, w2, b2


def _ref(x, w1, b1, w2, b2):
    return ((x @ w1 + b1) ** 2) @ w2 + b2


if __name__ == "__main__":
    key = jax.random.PRNGKey(0)
    kx, kx2, kx3, kp = jax.random.split(key, 4)
    w1, b1, w2, b2 = init_params(kp)

    # bf16-quantized reference (tracks the kernel's bf16-stream / f32-acc math).
    def ref_bf16(x):
        xb = x.astype(jnp.bfloat16).astype(jnp.float32)
        wb = w1.astype(jnp.bfloat16).astype(jnp.float32)
        return ((xb @ wb + b1) ** 2) @ w2 + b2

    # 1) Tiny batch (B=8): f32 streaming, exact vs f32 reference; TB=8 (no 128-pad).
    B = 8
    x = jax.random.normal(kx, (B, 784), dtype=jnp.float32)
    out = jax.block_until_ready(
        hecnn_forward(x, w1, b1, w2, b2, stream_dtype=jnp.float32))
    assert out.shape == (B, 1)
    assert jnp.allclose(out, _ref(x, w1, b1, w2, b2), atol=1e-4, rtol=1e-4)

    # 2) B=300: default bf16 streaming, split into 2 tiles (both TCs on v7x).
    B2 = 300
    x2 = jax.random.normal(kx2, (B2, 784), dtype=jnp.float32)
    out2 = jax.block_until_ready(hecnn_forward(x2, w1, b1, w2, b2))
    assert out2.shape == (B2, 1)
    assert jnp.allclose(out2, ref_bf16(x2), atol=2e-2, rtol=2e-2)

    # 3) B=600 with tb=128: 6 tiles -> exercises the triple-buffered x path.
    B3 = 600
    x3 = jax.random.normal(kx3, (B3, 784), dtype=jnp.float32)
    out3 = jax.block_until_ready(hecnn_forward(x3, w1, b1, w2, b2, tb=128))
    assert out3.shape == (B3, 1)
    assert jnp.allclose(out3, ref_bf16(x3), atol=2e-2, rtol=2e-2)

    print("KERNEL_OK")
</pallas_src>

<mosaic_0001>
module attributes {stable_mosaic.version = 11 : i64} {
  func.func @hecnn_kernel(%arg0: i32, %arg1: memref<8x784xf32, #tpu.memory_space<vmem>>, %arg2: memref<784x32xf32, #tpu.memory_space<vmem>>, %arg3: memref<1x32xf32, #tpu.memory_space<vmem>>, %arg4: memref<32x1xf32, #tpu.memory_space<vmem>>, %arg5: memref<1x1xf32, #tpu.memory_space<vmem>>, %arg6: memref<8x1xf32, #tpu.memory_space<vmem>>) attributes {dimension_semantics = [#tpu.dimension_semantics<parallel>], iteration_bounds = array<i64: 1>, scalar_prefetch = 0 : i64, scratch_operands = 0 : i64, tpu.core_type = #tpu.core_type<tc>, window_params = [{transform_indices = @transform_0, window_bounds = array<i64: 8, 784>}, {pipeline_mode = #tpu.pipeline_mode<synchronous>, transform_indices = @transform_1, window_bounds = array<i64: 784, 32>}, {pipeline_mode = #tpu.pipeline_mode<synchronous>, transform_indices = @transform_2, window_bounds = array<i64: 1, 32>}, {pipeline_mode = #tpu.pipeline_mode<synchronous>, transform_indices = @transform_3, window_bounds = array<i64: 32, 1>}, {pipeline_mode = #tpu.pipeline_mode<synchronous>, transform_indices = @transform_4, window_bounds = array<i64: 1, 1>}, {transform_indices = @transform_5, window_bounds = array<i64: 8, 1>}]} {
    %c0 = arith.constant 0 : index
    %c0_0 = arith.constant 0 : index
    %0 = vector.load %arg1[%c0, %c0_0] : memref<8x784xf32, #tpu.memory_space<vmem>>, vector<8x784xf32>
    %c0_1 = arith.constant 0 : index
    %c0_2 = arith.constant 0 : index
    %1 = vector.load %arg2[%c0_1, %c0_2] : memref<784x32xf32, #tpu.memory_space<vmem>>, vector<784x32xf32>
    %cst = arith.constant dense<0.000000e+00> : vector<8x32xf32>
    %2 = tpu.matmul %0, %1, %cst {dimension_numbers = #tpu.dot_dimension_numbers<[1], [0], [0], [1], [0, 0, 1, 1], [], []>} : vector<8x784xf32>, vector<784x32xf32>, vector<8x32xf32> -> vector<8x32xf32>
    %c0_3 = arith.constant 0 : index
    %c0_4 = arith.constant 0 : index
    %3 = vector.load %arg3[%c0_3, %c0_4] : memref<1x32xf32, #tpu.memory_space<vmem>>, vector<1x32xf32>
    %4 = vector.broadcast %3 : vector<1x32xf32> to vector<8x32xf32>
    %5 = arith.addf %2, %4 : vector<8x32xf32>
    %6 = arith.mulf %5, %5 : vector<8x32xf32>
    %c0_5 = arith.constant 0 : index
    %c0_6 = arith.constant 0 : index
    %7 = vector.load %arg4[%c0_5, %c0_6] : memref<32x1xf32, #tpu.memory_space<vmem>>, vector<32x1xf32>
    %cst_7 = arith.constant dense<0.000000e+00> : vector<8x1xf32>
    %8 = tpu.matmul %6, %7, %cst_7 {dimension_numbers = #tpu.dot_dimension_numbers<[1], [0], [0], [1], [0, 0, 1, 1], [], []>} : vector<8x32xf32>, vector<32x1xf32>, vector<8x1xf32> -> vector<8x1xf32>
    %c0_8 = arith.constant 0 : index
    %c0_9 = arith.constant 0 : index
    %9 = vector.load %arg5[%c0_8, %c0_9] : memref<1x1xf32, #tpu.memory_space<vmem>>, vector<1x1xf32>
    %10 = vector.broadcast %9 : vector<1x1xf32> to vector<8x1xf32>
    %11 = arith.addf %8, %10 : vector<8x1xf32>
    %c0_10 = arith.constant 0 : index
    %c0_11 = arith.constant 0 : index
    %12 = vector.load %arg6[%c0_10, %c0_11] : memref<8x1xf32, #tpu.memory_space<vmem>>, vector<8x1xf32>
    tpu.vector_store %arg6[%c0_10, %c0_11], %11 {strides = array<i32>} : memref<8x1xf32, #tpu.memory_space<vmem>>, vector<8x1xf32>,
    return
  }
  func.func @transform_0(%arg0: i32) -> (i32, i32) {
    %c0_i32 = arith.constant 0 : i32
    %c0_i32_0 = arith.constant 0 : i32
    return %arg0, %c0_i32 : i32, i32
  }
  func.func @transform_1(%arg0: i32) -> (i32, i32) {
    %c0_i32 = arith.constant 0 : i32
    %c0_i32_0 = arith.constant 0 : i32
    %c0_i32_1 = arith.constant 0 : i32
    return %c0_i32, %c0_i32_0 : i32, i32
  }
  func.func @transform_2(%arg0: i32) -> (i32, i32) {
    %c0_i32 = arith.constant 0 : i32
    %c0_i32_0 = arith.constant 0 : i32
    %c0_i32_1 = arith.constant 0 : i32
    return %c0_i32, %c0_i32_0 : i32, i32
  }
  func.func @transform_3(%arg0: i32) -> (i32, i32) {
    %c0_i32 = arith.constant 0 : i32
    %c0_i32_0 = arith.constant 0 : i32
    %c0_i32_1 = arith.constant 0 : i32
    return %c0_i32, %c0_i32_0 : i32, i32
  }
  func.func @transform_4(%arg0: i32) -> (i32, i32) {
    %c0_i32 = arith.constant 0 : i32
    %c0_i32_0 = arith.constant 0 : i32
    %c0_i32_1 = arith.constant 0 : i32
    return %c0_i32, %c0_i32_0 : i32, i32
  }
  func.func @transform_5(%arg0: i32) -> (i32, i32) {
    %c0_i32 = arith.constant 0 : i32
    %c0_i32_0 = arith.constant 0 : i32
    return %arg0, %c0_i32 : i32, i32
  }
}

</mosaic_0001>

<bundles_post_ra>
// kernel: tpu_custom_call.1
= control target key start
LH: loop header
LB: loop body
LE: loop exit
PB: predicated region body
PF: predicated region fallthrough
CT: control target
= control target key end

     0   :  { %vm754_vm0 = vmmov 0   ;;  %vm134_vm1 = vcmask 130048   ;;  %vm430_vm2 = vcmask 261120   ;;  %vm504_vm3 = vcmask 7168   ;;  %s1125_s1 = inlined_call_operand.vmem [shape: f32[784,32], index: 1, kind: input, shape index: {}]   ;;  %s1126_s0 = inlined_call_operand.vmem [shape: f32[8,784], index: 0, kind: input, shape index: {}]   ;;  %s1127_s3 = inlined_call_operand.vmem [shape: f32[32,1], index: 3, kind: input, shape index: {}]   ;;  %s1128_s4 = inlined_call_operand.<no memory space> [shape: f32[1,1], index: 4, kind: input, shape index: {}]   ;;  %s1129_s2 = inlined_call_operand.vmem [shape: f32[1,32], index: 2, kind: input, shape index: {}]   ;;  %s1130_s5 = inlined_call_operand.vmem [shape: f32[8,1], index: 5, kind: output, shape index: {}]  }
   0x1   :  { %v45_v0 = vld [vmem:[%s1125_s1 + $0x80] sm:$0xff]  ;;  %v46_v1 = vld [vmem:[%s1125_s1 + $0x88] sm:$0xff]  ;;  %v47_v11 = vld [vmem:[%s1125_s1 + $0x90] sm:$0xff] }
   0x2   :  { %v29_v2 = vld [vmem:[%s1125_s1] sm:$0xff]  ;;  %v645_v3 = vpack.c.bf16 %v46_v1, %v45_v0  ;;  %v30_v4 = vld [vmem:[%s1125_s1 + $0x8] sm:$0xff]  ;;  %v48_v13 = vld [vmem:[%s1125_s1 + $0x98] sm:$0xff] }
   0x3   :  { %v77_v5 = vld [vmem:[%s1125_s1 + $0x180] sm:$0xff]  ;;  %v78_v6 = vld [vmem:[%s1125_s1 + $0x188] sm:$0xff]  ;;  %v647_v7 = vpack.c.bf16 %v30_v4, %v29_v2  ;;  %v31_v14 = vld [vmem:[%s1125_s1 + $0x10] sm:$0xff]  ;;  %v649_v16 = vpack.c.bf16 %v48_v13, %v47_v11 }
   0x4   :  { %v677_v8 = vpack.c.bf16 %v78_v6, %v77_v5  ;;  %v61_v9 = vld [vmem:[%s1125_s1 + $0x100] sm:$0xff]  ;;  %v62_v10 = vld [vmem:[%s1125_s1 + $0x108] sm:$0xff]  ;;  %646 = vmatprep.subr.bf16.mxu0 %v645_v3  ;;  %v32_v15 = vld [vmem:[%s1125_s1 + $0x18] sm:$0xff] }
   0x5   :  { %v679_v12 = vpack.c.bf16 %v62_v10, %v61_v9  ;;  %648 = vmatpush3.bf16.msra.mxu0 %v647_v7  ;;  %v651_v17 = vpack.c.bf16 %v32_v15, %v31_v14  ;;  %v79_v18 = vld [vmem:[%s1125_s1 + $0x190] sm:$0xff]  ;;  %v80_v19 = vld [vmem:[%s1125_s1 + $0x198] sm:$0xff]  ;;  %v49_v23 = vld [vmem:[%s1125_s1 + $0xa0] sm:$0xff] }
   0x6   :  { %678 = vmatprep.subr.bf16.mxu1 %v677_v8  ;;  %v63_v20 = vld [vmem:[%s1125_s1 + $0x110] sm:$0xff]  ;;  %v681_v21 = vpack.c.bf16 %v80_v19, %v79_v18  ;;  %v64_v22 = vld [vmem:[%s1125_s1 + $0x118] sm:$0xff]  ;;  %v50_v24 = vld [vmem:[%s1125_s1 + $0xa8] sm:$0xff]  ;;  %650 = vmatprep.subr.bf16.mxu0 %v649_v16 }
   0x7   :  { %680 = vmatpush3.bf16.msra.mxu1 %v679_v12  ;;  %v683_v25 = vpack.c.bf16 %v64_v22, %v63_v20  ;;  %v653_v26 = vpack.c.bf16 %v50_v24, %v49_v23  ;;  %v33_v27 = vld [vmem:[%s1125_s1 + $0x20] sm:$0xff]  ;;  %v34_v28 = vld [vmem:[%s1125_s1 + $0x28] sm:$0xff]  ;;  %v51_v35 = vld [vmem:[%s1125_s1 + $0xb0] sm:$0xff] }
   0x8   :  { %v81_v29 = vld [vmem:[%s1125_s1 + $0x1a0] sm:$0xff]  ;;  %682 = vmatprep.subr.bf16.mxu1 %v681_v21  ;;  %v82_v30 = vld [vmem:[%s1125_s1 + $0x1a8] sm:$0xff]  ;;  %v655_v33 = vpack.c.bf16 %v34_v28, %v33_v27  ;;  %v52_v36 = vld [vmem:[%s1125_s1 + $0xb8] sm:$0xff] }
   0x9   :  { %v65_v31 = vld [vmem:[%s1125_s1 + $0x120] sm:$0xff]  ;;  %v66_v32 = vld [vmem:[%s1125_s1 + $0x128] sm:$0xff]  ;;  %652 = vmatpush3.bf16.msra.mxu0 %v651_v17  ;;  %v685_v34 = vpack.c.bf16 %v82_v30, %v81_v29  ;;  %v35_v37 = vld [vmem:[%s1125_s1 + $0x30] sm:$0xff]  ;;  %v657_v39 = vpack.c.bf16 %v52_v36, %v51_v35 }
   0xa   :  { %654 = vmatprep.subr.bf16.mxu0 %v653_v26  ;;  %v687_v38 = vpack.c.bf16 %v66_v32, %v65_v31  ;;  %v36_v40 = vld [vmem:[%s1125_s1 + $0x38] sm:$0xff]  ;;  %v83_v41 = vld [vmem:[%s1125_s1 + $0x1b0] sm:$0xff]  ;;  %v53_v46 = vld [vmem:[%s1125_s1 + $0xc0] sm:$0xff] }
   0xb   :  { %684 = vmatpush3.bf16.msra.mxu1 %v683_v25  ;;  %v84_v42 = vld [vmem:[%s1125_s1 + $0x1b8] sm:$0xff]  ;;  %v67_v44 = vld [vmem:[%s1125_s1 + $0x130] sm:$0xff]  ;;  %v54_v47 = vld [vmem:[%s1125_s1 + $0xc8] sm:$0xff]  ;;  %v659_v48 = vpack.c.bf16 %v36_v40, %v35_v37 }
   0xc   :  { %686 = vmatprep.subr.bf16.mxu1 %v685_v34  ;;  %v689_v43 = vpack.c.bf16 %v84_v42, %v83_v41  ;;  %v68_v45 = vld [vmem:[%s1125_s1 + $0x138] sm:$0xff]  ;;  %v85_v49 = vld [vmem:[%s1125_s1 + $0x1c0] sm:$0xff]  ;;  %v86_v50 = vld [vmem:[%s1125_s1 + $0x1c8] sm:$0xff]  ;;  %v661_v52 = vpack.c.bf16 %v54_v47, %v53_v46 }
   0xd   :  { %656 = vmatpush3.bf16.msra.mxu0 %v655_v33  ;;  %v691_v51 = vpack.c.bf16 %v68_v45, %v67_v44  ;;  %v37_v53 = vld [vmem:[%s1125_s1 + $0x40] sm:$0xff]  ;;  %v38_v54 = vld [vmem:[%s1125_s1 + $0x48] sm:$0xff]  ;;  %v693_v56 = vpack.c.bf16 %v86_v50, %v85_v49  ;;  %v55_v58 = vld [vmem:[%s1125_s1 + $0xd0] sm:$0xff]  ;;  %v753_v50 = vmov 0.0|0.0  }
   0xe   :  { %658 = vmatprep.subr.bf16.mxu0 %v657_v39  ;;  %v69_v55 = vld [vmem:[%s1125_s1 + $0x140] sm:$0xff]  ;;  %v70_v57 = vld [vmem:[%s1125_s1 + $0x148] sm:$0xff]  ;;  %v56_v59 = vld [vmem:[%s1125_s1 + $0xd8] sm:$0xff]  ;;  %v663_v62 = vpack.c.bf16 %v38_v54, %v37_v53 }
   0xf   :  { %688 = vmatpush3.bf16.msra.mxu1 %v687_v38  ;;  %v87_v60 = vld [vmem:[%s1125_s1 + $0x1d0] sm:$0xff]  ;;  %v88_v61 = vld [vmem:[%s1125_s1 + $0x1d8] sm:$0xff]  ;;  %v695_v63 = vpack.c.bf16 %v70_v57, %v69_v55  ;;  %v665_v0 = vpack.c.bf16 %v56_v59, %v55_v58  ;;  %v57_v6 = vld [vmem:[%s1125_s1 + $0xe0] sm:$0xff] }
  0x10   :  { %690 = vmatprep.subr.bf16.mxu1 %v689_v43  ;;  %v39_v1 = vld [vmem:[%s1125_s1 + $0x50] sm:$0xff]  ;;  %v40_v2 = vld [vmem:[%s1125_s1 + $0x58] sm:$0xff]  ;;  %v697_v4 = vpack.c.bf16 %v88_v61, %v87_v60  ;;  %v58_v7 = vld [vmem:[%s1125_s1 + $0xe8] sm:$0xff]  ;;  %v755_v60 = vmov 0.0  }
  0x11   :  { %660 = vmatpush3.bf16.msra.mxu0 %v659_v48  ;;  %v71_v3 = vld [vmem:[%s1125_s1 + $0x150] sm:$0xff]  ;;  %v72_v5 = vld [vmem:[%s1125_s1 + $0x158] sm:$0xff]  ;;  %v89_v8 = vld [vmem:[%s1125_s1 + $0x1e0] sm:$0xff]  ;;  %v667_v10 = vpack.c.bf16 %v40_v2, %v39_v1  ;;  %v669_v14 = vpack.c.bf16 %v58_v7, %v57_v6 }
  0x12   :  { %662 = vmatprep.subr.bf16.mxu0 %v661_v52  ;;  %v90_v9 = vld [vmem:[%s1125_s1 + $0x1e8] sm:$0xff]  ;;  %v41_v11 = vld [vmem:[%s1125_s1 + $0x60] sm:$0xff]  ;;  %v699_v13 = vpack.c.bf16 %v72_v5, %v71_v3  ;;  %v59_v19 = vld [vmem:[%s1125_s1 + $0xf0] sm:$0xff] }
  0x13   :  { %692 = vmatpush3.bf16.msra.mxu1 %v691_v51  ;;  %v23_v12 = vld [vmem:[%s1126_s0 + $0x8] sm:$0xff]  ;;  %v73_v16 = vld [vmem:[%s1125_s1 + $0x160] sm:$0xff]  ;;  %v701_v18 = vpack.c.bf16 %v90_v9, %v89_v8  ;;  %v60_v20 = vld [vmem:[%s1125_s1 + $0xf8] sm:$0xff] }
  0x14   :  { %694 = vmatprep.subr.bf16.mxu1 %v693_v56  ;;  %v42_v15 = vld [vmem:[%s1125_s1 + $0x68] sm:$0xff]  ;;  %202 = vmatprep.mubr.f32.mxu0 %v23_v12  ;;  %v25_v21 = vld [vmem:[%s1126_s0 + $0x18] sm:$0xff]  ;;  %v91_v22 = vld [vmem:[%s1125_s1 + $0x1f0] sm:$0xff]  ;;  %v673_v26 = vpack.c.bf16 %v60_v20, %v59_v19 }
  0x15   :  { %664 = vmatpush3.bf16.msra.mxu0 %v663_v62  ;;  %v74_v17 = vld [vmem:[%s1125_s1 + $0x168] sm:$0xff]  ;;  %v92_v23 = vld [vmem:[%s1125_s1 + $0x1f8] sm:$0xff]  ;;  %272 = vmatprep.mubr.f32.mxu1 %v25_v21  ;;  %v671_v24 = vpack.c.bf16 %v42_v15, %v41_v11  ;;  %v43_v27 = vld [vmem:[%s1125_s1 + $0x70] sm:$0xff] }
  0x16   :  { %666 = vmatprep.subr.bf16.mxu0 %v665_v0  ;;  %v703_v25 = vpack.c.bf16 %v74_v17, %v73_v16  ;;  %v44_v28 = vld [vmem:[%s1125_s1 + $0x78] sm:$0xff]  ;;  %v75_v29 = vld [vmem:[%s1125_s1 + $0x170] sm:$0xff]  ;;  %v705_v30 = vpack.c.bf16 %v92_v23, %v91_v22  ;;  %v109_v32 = vld [vmem:[%s1125_s1 + $0x280] sm:$0xff] }
  0x17   :  { %696 = vmatpush3.bf16.msra.mxu1 %v695_v63  ;;  %v76_v31 = vld [vmem:[%s1125_s1 + $0x178] sm:$0xff]  ;;  %v110_v33 = vld [vmem:[%s1125_s1 + $0x288] sm:$0xff]  ;;  %v675_v34 = vpack.c.bf16 %v44_v28, %v43_v27  ;;  %v93_v37 = vld [vmem:[%s1125_s1 + $0x200] sm:$0xff] }
  0x18   :  { %698 = vmatprep.subr.bf16.mxu1 %v697_v4  ;;  %v707_v35 = vpack.c.bf16 %v76_v31, %v75_v29  ;;  %v709_v36 = vpack.c.bf16 %v110_v33, %v109_v32  ;;  %v94_v38 = vld [vmem:[%s1125_s1 + $0x208] sm:$0xff]  ;;  %v111_v39 = vld [vmem:[%s1125_s1 + $0x290] sm:$0xff]  ;;  %v112_v40 = vld [vmem:[%s1125_s1 + $0x298] sm:$0xff] }
  0x19   :  { %668 = vmatpush3.bf16.msra.mxu0 %v667_v10  ;;  %v22_v41 = vld [vmem:[%s1126_s0] sm:$0xff]  ;;  %v711_v42 = vpack.c.bf16 %v94_v38, %v93_v37  ;;  %v24_v43 = vld [vmem:[%s1126_s0 + $0x10] sm:$0xff]  ;;  %v713_v45 = vpack.c.bf16 %v112_v40, %v111_v39  ;;  %v96_v46 = vld [vmem:[%s1125_s1 + $0x218] sm:$0xff] }
  0x1a   :  { %670 = vmatprep.subr.bf16.mxu0 %v669_v14  ;;  %v95_v44 = vld [vmem:[%s1125_s1 + $0x210] sm:$0xff]  ;;  %v113_v47 = vld [vmem:[%s1125_s1 + $0x2a0] sm:$0xff]  ;;  %v114_v48 = vld [vmem:[%s1125_s1 + $0x2a8] sm:$0xff] }
  0x1b   :  { %700 = vmatpush3.bf16.msra.mxu1 %v699_v13  ;;  %v27_v49 = vld [vmem:[%s1126_s0 + $0x28] sm:$0xff]  ;;  %v125_v51 = vld [vmem:[%s1125_s1 + $0x300] sm:$0xff]  ;;  %v715_v54 = vpack.c.bf16 %v96_v46, %v95_v44  ;;  %v717_v55 = vpack.c.bf16 %v114_v48, %v113_v47  ;;  %v115_v58 = vld [vmem:[%s1125_s1 + $0x2b0] sm:$0xff] }
  0x1c   :  { %702 = vmatprep.subr.bf16.mxu1 %v701_v18  ;;  %v126_v52 = vld [vmem:[%s1125_s1 + $0x308] sm:$0xff]  ;;  %v97_v56 = vld [vmem:[%s1125_s1 + $0x220] sm:$0xff]  ;;  %v116_v59 = vld [vmem:[%s1125_s1 + $0x2b8] sm:$0xff] }
  0x1d   :  { %672 = vmatpush3.bf16.msra.mxu0 %v671_v24  ;;  %v742_v53 = vpack.c.bf16 %v126_v52, %v125_v51  ;;  %v98_v57 = vld [vmem:[%s1125_s1 + $0x228] sm:$0xff]  ;;  %v28_v61 = vld [vmem:[%s1126_s0 + $0x30] sm:$0xff]  ;;  %v721_v63 = vpack.c.bf16 %v116_v59, %v115_v58  ;;  %v100_v1 = vld [vmem:[%s1125_s1 + $0x238] sm:$0xff] }
  0x1e   :  { %674 = vmatprep.subr.bf16.mxu0 %v673_v26  ;;  %v719_v62 = vpack.c.bf16 %v98_v57, %v97_v56  ;;  %v99_v0 = vld [vmem:[%s1125_s1 + $0x230] sm:$0xff]  ;;  %v117_v2 = vld [vmem:[%s1125_s1 + $0x2c0] sm:$0xff]  ;;  %v118_v3 = vld [vmem:[%s1125_s1 + $0x2c8] sm:$0xff] }
  0x1f   :  { %704 = vmatpush3.bf16.msra.mxu1 %v703_v25  ;;  %v723_v4 = vpack.c.bf16 %v100_v1, %v99_v0  ;;  %v725_v5 = vpack.c.bf16 %v118_v3, %v117_v2  ;;  %v101_v6 = vld [vmem:[%s1125_s1 + $0x240] sm:$0xff]  ;;  %v102_v7 = vld [vmem:[%s1125_s1 + $0x248] sm:$0xff]  ;;  %v119_v8 = vld [vmem:[%s1125_s1 + $0x2d0] sm:$0xff] }
  0x20   :  { %706 = vmatprep.subr.bf16.mxu1 %v705_v30  ;;  %v120_v9 = vld [vmem:[%s1125_s1 + $0x2d8] sm:$0xff]  ;;  %v727_v10 = vpack.c.bf16 %v102_v7, %v101_v6  ;;  %v103_v12 = vld [vmem:[%s1125_s1 + $0x250] sm:$0xff]  ;;  %v121_v14 = vld [vmem:[%s1125_s1 + $0x2e0] sm:$0xff] }
  0x21   :  { %676 = vmatpush3.bf16.msra.mxu0 %v675_v34  ;;  %v729_v11 = vpack.c.bf16 %v120_v9, %v119_v8  ;;  %v104_v13 = vld [vmem:[%s1125_s1 + $0x258] sm:$0xff]  ;;  %v122_v15 = vld [vmem:[%s1125_s1 + $0x2e8] sm:$0xff]  ;;  %v105_v18 = vld [vmem:[%s1125_s1 + $0x260] sm:$0xff]  ;;  %v10_v34 = vstv %s1128_s4 }
  0x22   :  { %710 = vmatprep.subr.bf16.mxu0 %v709_v36  ;;  %v731_v16 = vpack.c.bf16 %v104_v13, %v103_v12  ;;  %v733_v17 = vpack.c.bf16 %v122_v15, %v121_v14  ;;  %v106_v19 = vld [vmem:[%s1125_s1 + $0x268] sm:$0xff]  ;;  %v123_v20 = vld [vmem:[%s1125_s1 + $0x2f0] sm:$0xff]  ;;  %v124_v21 = vld [vmem:[%s1125_s1 + $0x2f8] sm:$0xff]  ;;  %11 = vst [vmem:[#allocation2] sm:$0x1] %v10_v34 }
  0x23   :  { %708 = vmatpush3.bf16.msra.mxu1 %v707_v35  ;;  %v735_v22 = vpack.c.bf16 %v106_v19, %v105_v18  ;;  %v737_v23 = vpack.c.bf16 %v124_v21, %v123_v20  ;;  %v107_v24 = vld [vmem:[%s1125_s1 + $0x270] sm:$0xff]  ;;  %v108_v25 = vld [vmem:[%s1125_s1 + $0x278] sm:$0xff]  ;;  %v26_v27 = vld [vmem:[%s1126_s0 + $0x20] sm:$0xff] }
  0x24   :  { %741 = vmatprep.subr.bf16.mxu1 %v753_v50  ;;  %203 = vmatmul.mubr.f32.vlgmr.msra.gmra.mrb[0].mxu0 %v22_v41  ;;  %v739_v26 = vpack.c.bf16 %v108_v25, %v107_v24  ;;  %v419_v28 = vld [vmem:[%s1127_s3] sm:$0xff]  ;;  %v420_v29 = vld [vmem:[%s1127_s3 + $0x8] sm:$0xff]  ;;  %v421_v31 = vld [vmem:[%s1127_s3 + $0x10] sm:$0xff] }
  0x25   :  { %712 = vmatpush3.bf16.msra.mxu0 %v711_v42  ;;  %342 = vmatprep.mubr.f32.mxu0 %v27_v49  ;;  %v745_v30 = vpack.c.bf16 %v420_v29, %v419_v28  ;;  %v422_v32 = vld [vmem:[%s1127_s3 + $0x18] sm:$0xff]  ;;  %v510_v36 = vld [vmem:[%s1129_s2] ss:$0 sm:$0xff] }
  0x26   :  { %273 = vmatmul.mubr.f32.vlgmr.msra.gmra.mrb[0].mxu1 %v24_v43  ;;  %714 = vmatprep.subr.bf16.mxu0 %v713_v45  ;;  %v748_v33 = vpack.c.bf16 %v422_v32, %v421_v31 }
  0x27   :  { %743 = vmatpush3.bf16.msra.mxu1 %v742_v53  ;;  %631 = vmatprep.mubr.msk.f32.mxu1 %vm754_vm0, %v755_v60 }
  0x28   :  { %744 = vmatprep.subr.bf16.mxu1 %v753_v50 }
  0x29   :  { %716 = vmatpush3.bf16.msra.mxu0 %v715_v54  ;;  %v512_v52 = vld [vmem:[#allocation2] ss:$0 sm:$0xff] }
  0x2a   :  { %718 = vmatprep.subr.bf16.mxu0 %v717_v55  ;;  %632 = vmatmul.mubr.msk.f32.vlgmr.msra.gmra.mrb[2].mxu1 %vm134_vm1, %v28_v61 }
  0x2b   :  { %642 = vmatprep.mubr.msk.f32.mxu1 %vm754_vm0, %v755_v60  ;;  %746 = vmatpush3.bf16.msra.mxu1 %v745_v30 }
  0x2c   :  { %747 = vmatprep.subr.bf16.mxu1 %v753_v50 }
  0x2d   :  { %720 = vmatpush3.bf16.msra.mxu0 %v719_v62 }
  0x2e   :  { %722 = vmatprep.subr.bf16.mxu0 %v721_v63 }
  0x2f   :  { %749 = vmatpush3.bf16.msra.mxu1 %v748_v33 }
  0x31   :  { %724 = vmatpush3.bf16.msra.mxu0 %v723_v4 }
  0x32   :  { %726 = vmatprep.subr.bf16.mxu0 %v725_v5 }
  0x35   :  { %728 = vmatpush3.bf16.msra.mxu0 %v727_v10 }
  0x36   :  { %730 = vmatprep.subr.bf16.mxu0 %v729_v11 }
  0x39   :  { %732 = vmatpush3.bf16.msra.mxu0 %v731_v16 }
  0x3a   :  { %734 = vmatprep.subr.bf16.mxu0 %v733_v17 }
  0x3d   :  { %736 = vmatpush3.bf16.msra.mxu0 %v735_v22 }
  0x3e   :  { %738 = vmatprep.subr.bf16.mxu0 %v737_v23 }
  0x41   :  { %740 = vmatpush3.bf16.msra.mxu0 %v739_v26 }
  0x44   :  { %343 = vmatmul.mubr.f32.vlgmr.msra.gmra.mrb[2].mxu0 %v26_v27 }
  0xf7   :  { %v546_v35 = vpop.f32.mrb[0].mxu0 }
  0xf8   :  { %v547_v37 = vpop.f32.mrb[1].mxu0 }
  0xf9   :  { %v581_v38 = vpop.f32.mrb[0].mxu1  ;;  %v548_v39 = vadd.f32 %v547_v37, %v546_v35 }
  0xfa   :  { %v582_v40 = vpop.f32.mrb[1].mxu1 }
  0xfb   :  { %v583_v41 = vadd.f32 %v582_v40, %v581_v38  ;;  %v205_v42 = vadd.f32 %v548_v39, %v510_v36 }
  0xfd   :  { %v275_v43 = vadd.f32 %v583_v41, %v205_v42  ;;  %v414_v44 = vpop.f32.mrb[2].mxu1 }
  0xfe   :  { %v633_v45 = vpop.f32.mrb[3].mxu1 }
 0x117   :  { %v616_v46 = vpop.f32.mrb[2].mxu0 }
 0x118   :  { %v617_v47 = vpop.f32.mrb[3].mxu0 }
 0x119   :  { %v618_v48 = vadd.f32 %v617_v47, %v616_v46 }
 0x11b   :  { %v345_v49 = vadd.f32 %v618_v48, %v275_v43 }
 0x11d   :  { %v415_v50 = vadd.f32 %v414_v44, %v345_v49 }
 0x11f   :  { %v418_v51 = vmul.f32 %v415_v50, %v415_v50 }
 0x121   :  { %643 = vmatmul.mubr.msk.f32.vlgmr.msra.gmra.mrb[4].mxu1 %vm430_vm2, %v418_v51 }
 0x1f4   :  { %v500_v53 = vpop.f32.mrb[4].mxu1 }
 0x1f5   :  { %v501_v54 = vadd.f32 %v512_v52, %v500_v53  ;;  %v644_v55 = vpop.f32.mrb[5].mxu1 }
 0x1f7   :  { %505 = vst.msk [vmem:[%s1130_s5] sm:$0xff] %vm504_vm3, %v501_v54 }

</bundles_post_ra>
